<compile_context>
chip_gen: v7x
topology: tpu7x:2x2x1
jax: 0.10.0
libtpu: 0.0.40
codegen_flags: <defaults>
</compile_context>

<pallas_src>
import functools

import jax
import jax.numpy as jnp
import numpy as np
from jax import lax
from jax.experimental import pallas as pl
from jax.experimental.pallas import tpu as pltpu


_TAPS = ((0, 0), (0, 1), (1, 0), (1, 1))        # (di, dj): view uses x[i+di, j+dj]
_PARITIES = ((0, 0), (0, 1), (1, 0), (1, 1))    # (p, q): out row block = out[2i+p, 2j+q]


def _predictor_kernel(x_ref, h_ref, w_ref, b_ref, z_ref, *, w_img):
    """Fused (ConvT k3 s2 p1 -> 1x1 conv) for one (batch, lane-tile) grid point.

    x_ref: (Cin, LT)      current lane tile of x (flattened H*W on lanes)
    h_ref: (Cin, W+1)     halo: the W+1 flat positions following this tile
    w_ref: (4, 4*NC, Cin) per-tap fused weight blocks (parity blocks stacked)
    b_ref: (4*NC, 1)      fused bias (conv1_w @ up_b + conv1_b), f32
    z_ref: (4*NC, LT)     output: parity*NC on sublanes, positions on lanes
    """
    W = w_img
    xt = x_ref[...]                                               # x[i, j]
    xh = h_ref[...]
    # Shifted tap views built in VMEM (lane concats: XLU/ld-st slots have slack;
    # HBM is the bottleneck).  Values that land on the F.pad border row/col are
    # garbage here and get overwritten post-kernel, so no masking is needed.
    x01 = jnp.concatenate([xt[:, 1:], xh[:, :1]], axis=1)         # x[i,   j+1]
    x10 = jnp.concatenate([xt[:, W:], xh[:, :W]], axis=1)         # x[i+1, j  ]
    x11 = jnp.concatenate([xt[:, W + 1:], xh[:, :W + 1]], axis=1) # x[i+1, j+1]

    z = jnp.dot(w_ref[0], xt, preferred_element_type=jnp.float32)
    z = z + jnp.dot(w_ref[1], x01, preferred_element_type=jnp.float32)
    z = z + jnp.dot(w_ref[2], x10, preferred_element_type=jnp.float32)
    z = z + jnp.dot(w_ref[3], x11, preferred_element_type=jnp.float32)
    z_ref[...] = (z + b_ref[...]).astype(z_ref.dtype)


def _pick_lane_tile(hw, w_img, cin, nc, in_bytes, out_bytes,
                    cap_lanes=16384, vmem_budget=20 << 20):
    """Lane tile: a multiple of 128 dividing H*W (lane-dense, unmasked stores),
    sized from a VMEM budget (double-buffered x + out blocks + the in-kernel tap
    views), capped at 16K lanes so per-step overhead (~0.35us) stays negligible
    while the footprint fits v7x's 64 MiB physical / 32 MiB scoped VMEM."""
    per_lane = 5 * cin * in_bytes + 4 * nc * (2 * out_bytes + 4)
    cap = max(128, min(cap_lanes, vmem_budget // per_lane))
    if hw <= cap:
        return hw                                   # whole image in one tile
    t = (min(cap, hw) // 128) * 128
    lo = max(128, w_img + 2)
    while t >= lo:
        if hw % t == 0:
            return t
        t -= 128
    # TODO(synk): H*W has no suitable 128-aligned divisor; falls back to one
    # tile per image (tail masking / padded lane axis not implemented).
    return hw


@functools.partial(jax.jit, static_argnames=("th", "tw", "out_dtype"))
def _forward(x, up_w, up_b, c1_w, c1_b, *, th, tw, out_dtype):
    N, Cin, H, W = x.shape
    Cmid = up_w.shape[1]                    # in_channels // 4
    NC = c1_w.shape[0]                      # num_classes
    # ConvTranspose2d(k=3, s=2, p=1) gives (2H-1, 2W-1); with target 2H x 2W the
    # F.pad adds exactly one zero row/col (diffY = diffX = 1).
    assert th == 2 * H and tw == 2 * W, \
        "kernel assumes target spatial = 2x input spatial (diffY = diffX = 1)"
    # TODO(synk): arbitrary diffY/diffX (target != 2*input) not specialized in-kernel.
    assert H >= 2 and W >= 2

    f32 = jnp.float32
    cdt = x.dtype                           # MXU input dtype follows activations
    c1_mat = c1_w.reshape(NC, Cmid).astype(f32)

    # ---- fold the 1x1 conv into every transposed-conv tap ----
    # w_eff[kh, kw][cin, n] = sum_m up_w[cin, m, kh, kw] * c1_w[n, m]
    w_eff = jnp.einsum("icab,nc->abin", up_w.astype(f32), c1_mat)   # (3,3,Cin,NC)

    # Per-tap weight blocks: rows = 4 parity blocks (NC each), one (4*NC, Cin)
    # matrix per shifted view.  out[2i+p, 2j+q] uses kernel tap (kh, kw) with
    # kh = p - 2*di + 1, kw = q - 2*dj + 1 applied to x[i+di, j+dj].
    zero_blk = jnp.zeros((NC, Cin), f32)
    w_views = []
    for (di, dj) in _TAPS:
        blocks = []
        for (p, q) in _PARITIES:
            kh, kw = p - 2 * di + 1, q - 2 * dj + 1
            blocks.append(w_eff[kh, kw].T if (0 <= kh <= 2 and 0 <= kw <= 2)
                          else zero_blk)
        w_views.append(jnp.concatenate(blocks, axis=0))             # (4*NC, Cin)
    w_all = jnp.stack(w_views, axis=0).astype(cdt)                  # (4, 4*NC, Cin)
    b_eff = c1_mat @ up_b.astype(f32) + c1_b.astype(f32)            # (NC,)
    bias = jnp.tile(b_eff, 4).reshape(4 * NC, 1)                    # (4*NC, 1) f32

    HW = H * W
    LT = _pick_lane_tile(HW, W, Cin, NC,
                         jnp.dtype(cdt).itemsize, jnp.dtype(out_dtype).itemsize)
    S = HW // LT

    x_flat = x.reshape(N, Cin, HW)          # contiguous merge -> free (no copy)
    # Tiny halo array: for tile s, the W+1 flat positions following it (clamped
    # past the image end -- those values only feed the overwritten border).
    hidx = np.minimum((np.arange(S)[:, None] + 1) * LT
                      + np.arange(W + 1)[None, :], HW - 1)          # (S, W+1)
    halo = jnp.transpose(x_flat[:, :, hidx], (0, 2, 1, 3))          # (N, S, Cin, W+1)

    kernel = functools.partial(_predictor_kernel, w_img=W)
    z = pl.pallas_call(
        kernel,
        out_shape=jax.ShapeDtypeStruct((N, 4 * NC, HW), out_dtype),
        grid=(N, S),
        in_specs=[
            # x: read exactly once.  (On v7x, if xprof shows exposed DMA on this
            # stream, add pipeline_mode=pl.Buffered(3).)
            pl.BlockSpec((None, Cin, LT), lambda n, s: (n, 0, s)),
            pl.BlockSpec((None, None, Cin, W + 1), lambda n, s: (n, s, 0, 0)),
            pl.BlockSpec((4, 4 * NC, Cin), lambda n, s: (0, 0, 0)),
            pl.BlockSpec((4 * NC, 1), lambda n, s: (0, 0)),
        ],
        out_specs=pl.BlockSpec((None, 4 * NC, LT), lambda n, s: (n, 0, s)),
        compiler_params=pltpu.CompilerParams(
            dimension_semantics=("parallel", "parallel"),
            vmem_limit_bytes=32 * 1024 * 1024,
        ),
    )(x_flat, halo, w_all, bias)

    # ---- parity interleave + NCHW: one pass over the output (fused with cast) ----
    z = z.reshape(N, 2, 2, NC, H, W)                                # (n,p,q,c,i,j)
    out = jnp.transpose(z, (0, 3, 4, 1, 5, 2)).reshape(N, NC, 2 * H, 2 * W)
    # The F.pad row/col before the 1x1 conv is exactly conv1_b: tiny in-place
    # border fix instead of streaming a per-lane mask through the kernel.
    cb = c1_b.astype(out_dtype)[None, :, None]
    out = out.at[:, :, 2 * H - 1, :].set(cb)
    out = out.at[:, :, :, 2 * W - 1].set(cb)
    return out


def base_predictor_forward(x_nchw, target_nchw, params, out_dtype=jnp.float32):
    """Pallas implementation of BasePredictor.forward(input, target)."""
    if isinstance(x_nchw, (list, tuple)):
        x_nchw = x_nchw[-1]
    return _forward(x_nchw, params["up_w"], params["up_b"],
                    params["c1_w"], params["c1_b"],
                    th=int(target_nchw.shape[2]), tw=int(target_nchw.shape[3]),
                    out_dtype=out_dtype)


def reference_forward(x, target, params):
    """Pure-JAX reference replicating the PyTorch module exactly (f32)."""
    wt, bt, cw, cb = params["up_w"], params["up_b"], params["c1_w"], params["c1_b"]
    # ConvTranspose2d(k=3, s=2, p=1) == dilated conv with flipped/transposed weight.
    rhs = jnp.flip(wt, axis=(2, 3)).transpose(1, 0, 2, 3)             # (Cmid, Cin, 3, 3)
    y = lax.conv_general_dilated(
        x, rhs, window_strides=(1, 1), padding=((1, 1), (1, 1)),
        lhs_dilation=(2, 2),
        dimension_numbers=("NCHW", "OIHW", "NCHW")) + bt.reshape(1, -1, 1, 1)
    diffY = target.shape[2] - y.shape[2]
    diffX = target.shape[3] - y.shape[3]
    y = jnp.pad(y, ((0, 0), (0, 0), (0, diffY), (0, diffX)))
    out = lax.conv_general_dilated(
        y, cw, (1, 1), "VALID",
        dimension_numbers=("NCHW", "OIHW", "NCHW")) + cb.reshape(1, -1, 1, 1)
    return out


if __name__ == "__main__":
    key = jax.random.PRNGKey(0)
    k1, k2, k3, k4, k5 = jax.random.split(key, 5)

    N, Cin, H, W = 2, 16, 16, 16
    NC = 5
    Cmid = Cin // 4

    x = jax.random.normal(k1, (N, Cin, H, W), jnp.float32)
    # target is only used for its spatial size in the PyTorch forward
    target = jnp.zeros((N, 1, 2 * H, 2 * W), jnp.float32)

    params = {
        "up_w": 0.1 * jax.random.normal(k2, (Cin, Cmid, 3, 3), jnp.float32),
        "up_b": 0.1 * jax.random.normal(k3, (Cmid,), jnp.float32),
        "c1_w": 0.1 * jax.random.normal(k4, (NC, Cmid, 1, 1), jnp.float32),
        "c1_b": 0.1 * jax.random.normal(k5, (NC,), jnp.float32),
    }

    ref = reference_forward(x, target, params)

    # f32 activations + f32 output: near-exact vs the f32 reference.
    out_f32 = jax.block_until_ready(
        base_predictor_forward(x, target, params, out_dtype=jnp.float32))
    assert out_f32.shape == (N, NC, 2 * H, 2 * W)
    np.testing.assert_allclose(np.asarray(out_f32), np.asarray(ref),
                               atol=1e-4, rtol=1e-4)

    # bf16 activations + bf16 output: the recommended bandwidth-saving path
    # (halves x reads and z writes; the only one to ship on v5e).
    out_bf16 = jax.block_until_ready(
        base_predictor_forward(x.astype(jnp.bfloat16), target, params,
                               out_dtype=jnp.bfloat16))
    np.testing.assert_allclose(np.asarray(out_bf16.astype(jnp.float32)),
                               np.asarray(ref), atol=5e-2, rtol=5e-2)

    print("KERNEL_OK")
</pallas_src>

<mosaic_0001>
module attributes {stable_mosaic.version = 11 : i64} {
  func.func @_predictor_kernel(%arg0: i32, %arg1: i32, %arg2: memref<1x16x256xf32, #tpu.memory_space<vmem>>, %arg3: memref<1x1x16x17xf32, #tpu.memory_space<vmem>>, %arg4: memref<4x20x16xf32, #tpu.memory_space<vmem>>, %arg5: memref<20x1xf32, #tpu.memory_space<vmem>>, %arg6: memref<1x20x256xf32, #tpu.memory_space<vmem>>) attributes {dimension_semantics = [#tpu.dimension_semantics<parallel>, #tpu.dimension_semantics<parallel>], iteration_bounds = array<i64: 2, 1>, scalar_prefetch = 0 : i64, scratch_operands = 0 : i64, tpu.core_type = #tpu.core_type<tc>, window_params = [{transform_indices = @transform_0, window_bounds = array<i64: 1, 16, 256>}, {transform_indices = @transform_1, window_bounds = array<i64: 1, 1, 16, 17>}, {pipeline_mode = #tpu.pipeline_mode<synchronous>, transform_indices = @transform_2, window_bounds = array<i64: 4, 20, 16>}, {pipeline_mode = #tpu.pipeline_mode<synchronous>, transform_indices = @transform_3, window_bounds = array<i64: 20, 1>}, {transform_indices = @transform_4, window_bounds = array<i64: 1, 20, 256>}]} {
    %c0 = arith.constant 0 : index
    %c0_0 = arith.constant 0 : index
    %c0_1 = arith.constant 0 : index
    %0 = vector.load %arg2[%c0, %c0_0, %c0_1] : memref<1x16x256xf32, #tpu.memory_space<vmem>>, vector<1x16x256xf32>
    %1 = vector.shape_cast %0 : vector<1x16x256xf32> to vector<16x256xf32>
    %c0_2 = arith.constant 0 : index
    %c0_3 = arith.constant 0 : index
    %c0_4 = arith.constant 0 : index
    %c0_5 = arith.constant 0 : index
    %2 = vector.load %arg3[%c0_2, %c0_3, %c0_4, %c0_5] : memref<1x1x16x17xf32, #tpu.memory_space<vmem>>, vector<1x1x16x17xf32>
    %3 = vector.shape_cast %2 : vector<1x1x16x17xf32> to vector<16x17xf32>
    %4 = vector.extract_strided_slice %1 {offsets = [0, 1], sizes = [16, 255], strides = [1, 1]} : vector<16x256xf32> to vector<16x255xf32>
    %5 = vector.extract_strided_slice %3 {offsets = [0, 0], sizes = [16, 1], strides = [1, 1]} : vector<16x17xf32> to vector<16x1xf32>
    %6 = tpu.concatenate %4, %5 in 1 : vector<16x255xf32>, vector<16x1xf32> -> vector<16x256xf32>
    %7 = vector.extract_strided_slice %1 {offsets = [0, 16], sizes = [16, 240], strides = [1, 1]} : vector<16x256xf32> to vector<16x240xf32>
    %8 = vector.extract_strided_slice %3 {offsets = [0, 0], sizes = [16, 16], strides = [1, 1]} : vector<16x17xf32> to vector<16x16xf32>
    %9 = tpu.concatenate %7, %8 in 1 : vector<16x240xf32>, vector<16x16xf32> -> vector<16x256xf32>
    %10 = vector.extract_strided_slice %1 {offsets = [0, 17], sizes = [16, 239], strides = [1, 1]} : vector<16x256xf32> to vector<16x239xf32>
    %11 = tpu.concatenate %10, %3 in 1 : vector<16x239xf32>, vector<16x17xf32> -> vector<16x256xf32>
    %c0_6 = arith.constant 0 : index
    %c0_7 = arith.constant 0 : index
    %c0_8 = arith.constant 0 : index
    %12 = vector.load %arg4[%c0_6, %c0_7, %c0_8] : memref<4x20x16xf32, #tpu.memory_space<vmem>>, vector<1x20x16xf32>
    %13 = vector.shape_cast %12 : vector<1x20x16xf32> to vector<20x16xf32>
    %cst = arith.constant dense<0.000000e+00> : vector<20x256xf32>
    %14 = tpu.matmul %13, %1, %cst {dimension_numbers = #tpu.dot_dimension_numbers<[1], [0], [0], [1], [0, 0, 1, 1], [], []>} : vector<20x16xf32>, vector<16x256xf32>, vector<20x256xf32> -> vector<20x256xf32>
    %c1 = arith.constant 1 : index
    %c0_9 = arith.constant 0 : index
    %c0_10 = arith.constant 0 : index
    %15 = vector.load %arg4[%c1, %c0_9, %c0_10] : memref<4x20x16xf32, #tpu.memory_space<vmem>>, vector<1x20x16xf32>
    %16 = vector.shape_cast %15 : vector<1x20x16xf32> to vector<20x16xf32>
    %cst_11 = arith.constant dense<0.000000e+00> : vector<20x256xf32>
    %17 = tpu.matmul %16, %6, %cst_11 {dimension_numbers = #tpu.dot_dimension_numbers<[1], [0], [0], [1], [0, 0, 1, 1], [], []>} : vector<20x16xf32>, vector<16x256xf32>, vector<20x256xf32> -> vector<20x256xf32>
    %18 = arith.addf %14, %17 : vector<20x256xf32>
    %c2 = arith.constant 2 : index
    %c0_12 = arith.constant 0 : index
    %c0_13 = arith.constant 0 : index
    %19 = vector.load %arg4[%c2, %c0_12, %c0_13] : memref<4x20x16xf32, #tpu.memory_space<vmem>>, vector<1x20x16xf32>
    %20 = vector.shape_cast %19 : vector<1x20x16xf32> to vector<20x16xf32>
    %cst_14 = arith.constant dense<0.000000e+00> : vector<20x256xf32>
    %21 = tpu.matmul %20, %9, %cst_14 {dimension_numbers = #tpu.dot_dimension_numbers<[1], [0], [0], [1], [0, 0, 1, 1], [], []>} : vector<20x16xf32>, vector<16x256xf32>, vector<20x256xf32> -> vector<20x256xf32>
    %22 = arith.addf %18, %21 : vector<20x256xf32>
    %c3 = arith.constant 3 : index
    %c0_15 = arith.constant 0 : index
    %c0_16 = arith.constant 0 : index
    %23 = vector.load %arg4[%c3, %c0_15, %c0_16] : memref<4x20x16xf32, #tpu.memory_space<vmem>>, vector<1x20x16xf32>
    %24 = vector.shape_cast %23 : vector<1x20x16xf32> to vector<20x16xf32>
    %cst_17 = arith.constant dense<0.000000e+00> : vector<20x256xf32>
    %25 = tpu.matmul %24, %11, %cst_17 {dimension_numbers = #tpu.dot_dimension_numbers<[1], [0], [0], [1], [0, 0, 1, 1], [], []>} : vector<20x16xf32>, vector<16x256xf32>, vector<20x256xf32> -> vector<20x256xf32>
    %26 = arith.addf %22, %25 : vector<20x256xf32>
    %c0_18 = arith.constant 0 : index
    %c0_19 = arith.constant 0 : index
    %27 = vector.load %arg5[%c0_18, %c0_19] : memref<20x1xf32, #tpu.memory_space<vmem>>, vector<20x1xf32>
    %28 = vector.broadcast %27 : vector<20x1xf32> to vector<20x256xf32>
    %29 = arith.addf %26, %28 : vector<20x256xf32>
    %c0_20 = arith.constant 0 : index
    %c0_21 = arith.constant 0 : index
    %c0_22 = arith.constant 0 : index
    %30 = vector.load %arg6[%c0_20, %c0_21, %c0_22] : memref<1x20x256xf32, #tpu.memory_space<vmem>>, vector<1x20x256xf32>
    %31 = vector.shape_cast %30 : vector<1x20x256xf32> to vector<20x256xf32>
    %32 = vector.shape_cast %29 : vector<20x256xf32> to vector<1x20x256xf32>
    tpu.vector_store %arg6[%c0_20, %c0_21, %c0_22], %32 {strides = array<i32>} : memref<1x20x256xf32, #tpu.memory_space<vmem>>, vector<1x20x256xf32>,
    return
  }
  func.func @transform_0(%arg0: i32, %arg1: i32) -> (i32, i32, i32) {
    %c0_i32 = arith.constant 0 : i32
    %c0_i32_0 = arith.constant 0 : i32
    return %arg0, %c0_i32, %arg1 : i32, i32, i32
  }
  func.func @transform_1(%arg0: i32, %arg1: i32) -> (i32, i32, i32, i32) {
    %c0_i32 = arith.constant 0 : i32
    %c0_i32_0 = arith.constant 0 : i32
    %c0_i32_1 = arith.constant 0 : i32
    return %arg0, %arg1, %c0_i32, %c0_i32_0 : i32, i32, i32, i32
  }
  func.func @transform_2(%arg0: i32, %arg1: i32) -> (i32, i32, i32) {
    %c0_i32 = arith.constant 0 : i32
    %c0_i32_0 = arith.constant 0 : i32
    %c0_i32_1 = arith.constant 0 : i32
    %c0_i32_2 = arith.constant 0 : i32
    return %c0_i32, %c0_i32_0, %c0_i32_1 : i32, i32, i32
  }
  func.func @transform_3(%arg0: i32, %arg1: i32) -> (i32, i32) {
    %c0_i32 = arith.constant 0 : i32
    %c0_i32_0 = arith.constant 0 : i32
    %c0_i32_1 = arith.constant 0 : i32
    return %c0_i32, %c0_i32_0 : i32, i32
  }
  func.func @transform_4(%arg0: i32, %arg1: i32) -> (i32, i32, i32) {
    %c0_i32 = arith.constant 0 : i32
    %c0_i32_0 = arith.constant 0 : i32
    return %arg0, %c0_i32, %arg1 : i32, i32, i32
  }
}

</mosaic_0001>

<bundles_post_ra>
// kernel: tile.8
= control target key start
LH: loop header
LB: loop body
LE: loop exit
PB: predicated region body
PF: predicated region fallthrough
CT: control target
= control target key end

     0   :  { %s22_s0 = inlined_call_operand.vmem [shape: f32[5], index: 0, kind: input, shape index: {}]   ;;  %s23_s1 = inlined_call_operand.vmem [shape: f32[4,5], index: 1, kind: output, shape index: {}]  }
   0x1   :  { %v4_v0 = vld [vmem:[%s22_s0] ss:$0 sm:$0xff] }
   0x2   :  { %5 = vst [vmem:[%s23_s1] sm:$0xf] %v4_v0 }

// kernel: tile.0
= control target key start
LH: loop header
LB: loop body
LE: loop exit
PB: predicated region body
PF: predicated region fallthrough
CT: control target
= control target key end

     0   :  { %s42_s8 = smov 127   ;;  %vm7_vm0 = vcmask 7168   ;;  %s43_s11 = smov 124   ;;  %s78_s0 = inlined_call_operand.vmem [shape: f32[4,5], index: 0, kind: input, shape index: {}]   ;;  %s79_s1 = inlined_call_operand.vmem [shape: f32[20,1], index: 1, kind: output, shape index: {}]  }
   0x1   :  { %v4_v0 = vld [vmem:[%s78_s0] sm:$0xf]  ;;  %s41_s0 = smov 125   ;;  %s44_s12 = smov 126  }
   0x2   :  { %5 = vst [vmem:[#allocation0] sm:$0xf] %v4_v0 }
   0x9   :  { %v21_v1 = vld [vmem:[#allocation0] sm:$0xf]  }
   0xa   :  { %v9_v2 = vld [vmem:[#allocation0] sm:$0xf]   ;;  %22 = vrot.lane.b32.xlu1 %v21_v1, %s41_s0 }
   0xb   :  { %10 = vrot.lane.b32.xlu0 %v9_v2, %s42_s8  ;;  %v6_v3 = vld [vmem:[#allocation0] sm:$0xf]  }
   0xc   :  { %v27_v4 = vld [vmem:[#allocation0] sm:$0xf]   ;;  %8 = vst.msk [vmem:[%s79_s1] ss:$5 sm:$0xf] %vm7_vm0, %v6_v3  }
   0xd   :  { %v15_v5 = vld [vmem:[#allocation0] sm:$0xf]  }
   0xe   :  { %28 = vrot.lane.b32.xlu1 %v27_v4, %s43_s11 }
   0xf   :  { %16 = vrot.lane.b32.xlu0 %v15_v5, %s44_s12 }
  0x7c   :  { %v23_v6 = vpop.permute.xlu1 %22  }
  0x7d   :  { %v11_v7 = vpop.permute.xlu0 %10   ;;  %35 = vst.msk [vmem:[%s79_s1 + $0x3] ss:$5 sm:$0xf] %vm7_vm0, %v23_v6  }
  0x7e   :  { %33 = vst.msk [vmem:[%s79_s1 + $0x1] ss:$5 sm:$0xf] %vm7_vm0, %v11_v7  }
  0x80   :  { %v29_v8 = vpop.permute.xlu1 %28  }
  0x81   :  { %v17_v9 = vpop.permute.xlu0 %16   ;;  %36 = vst.msk [vmem:[%s79_s1 + $0x4] ss:$5 sm:$0xf] %vm7_vm0, %v29_v8  }
  0x82   :  { %34 = vst.msk [vmem:[%s79_s1 + $0x2] ss:$5 sm:$0xf] %vm7_vm0, %v17_v9  }

// kernel: _forward.1
= control target key start
LH: loop header
LB: loop body
LE: loop exit
PB: predicated region body
PF: predicated region fallthrough
CT: control target
= control target key end

     0   :  { %s1086_s15 = smov 0   ;;  %s1088_s16 = smov 0   ;;  %s1230_s0 = inlined_call_operand.vmem [shape: f32[2,16,256], index: 0, kind: input, shape index: {}]   ;;  %s1231_s1 = inlined_call_operand.vmem [shape: f32[2,1,16,17], index: 1, kind: input, shape index: {}]   ;;  %s1232_s2 = inlined_call_operand.vmem [shape: f32[4,20,16], index: 2, kind: input, shape index: {}]   ;;  %s1233_s3 = inlined_call_operand.vmem [shape: f32[20,1], index: 3, kind: input, shape index: {}]   ;;  %s1234_s4 = inlined_call_operand.vmem [shape: f32[2,20,256], index: 4, kind: output, shape index: {}]  }
   0x1   :  { %s1090_s17 = smov 0  }
   0x2 LB: > { %s26_s18 = sadd.s32 1, %s1050_s16  ;;  %p890_p0 = scmp.ge.s32.totalorder %s1054_s17, 1  ;;  %s1054_s17 = sphi %s1090_s17, %s14_s17   ;;  %s1050_s16 = sphi %s1088_s16, %s1236_s16   ;;  %s1046_s15 = sphi %s1086_s15, %s1235_s15  }
   0x3   : > { %p28_p1 = scmp.ge.s32.totalorder %s26_s18, 2  ;;  %p199_p2 = scmp.lt.s32.totalorder %s1054_s17, 3 }
   0x5   : > { %s1238_s18 = smov (%p28_p1, %s26_s18), 0  ;;  %p200_p3 = pnand %p890_p0, %p199_p2 }
   0x6   : > { %p243_p4 = scmp.lt.s32.totalorder (!%p200_p3), %s1046_s15, 1  ;;  %s1056_s27 = smov (!%p200_p3), 112   ;;  %v1058_v8 = vmov (!%p200_p3), 0.0   ;;  %v748_v12 = vld [vmem:[%s1233_s3] sm:$0xff] (!%p200_p3)  ;;  %v749_v13 = vld [vmem:[%s1233_s3 + $0x8] sm:$0xff] (!%p200_p3)  ;;  %v1060_v14 = vmov (!%p200_p3), 0  }
   0x7   : > { %203 = sbr.rel (%p200_p3) target bundleno = 389 (0x185), region = 36  ;;  %s1057_s28 = smov (!%p200_p3), 127   ;;  %433 = vmatprep.mubr.f32.mxu1 (!%p200_p3), %v1058_v8  ;;  %621 = vmatprep.mubr.f32.mxu0 (!%p200_p3), %v1058_v8  ;;  %v750_v15 = vld [vmem:[%s1233_s3 + $0x10] sm:$0xf] (!%p200_p3)  ;;  %vm289_vm0 = vcmask (!%p200_p3), 1039360   ;;  %vm314_vm1 = vcmask (!%p200_p3), 916480  }
   0x8   : > { %s1059_s29 = smov (!%p200_p3), 111   ;;  %1030 = vset.pattern.permute.xlu1 (!%p200_p3), %v1060_v14  ;;  %1031 = vset.pattern.permute.xlu0 (!%p200_p3), %v1060_v14  ;;  %vm337_vm2 = vcmask (!%p200_p3), 908288   ;;  %v896_v52 = vld [vmem:[%s1232_s2 + $0x18] sm:$0xff] (!%p200_p3)  ;;  %vm359_vm3 = vcmask (!%p200_p3), 130048   ;;  %v905_v53 = vld [vmem:[%s1232_s2 + $0x30] sm:$0xff] (!%p200_p3)  ;;  %v897_v60 = vld [vmem:[%s1232_s2 + $0x20] sm:$0xff] (!%p200_p3) }
   0x9   : > { %v906_v61 = vld [vmem:[%s1232_s2 + $0x38] sm:$0xff] (!%p200_p3) }
   0xe   : > { %s1240_s15 = smov (!%p243_p4, %s1046_s15), 1 }
   0xf   : > { %s919_s19 = sshll.u32 %s1240_s15, 5  ;;  %s920_s20 = sshll.u32 %s1240_s15, 4 }
  0x10   : > { %s250_s23 = scalar_lea.vmem %s1230_s0, %s919_s19  ;;  %s260_s26 = scalar_lea.vmem %s1231_s1, %s920_s20 }
  0x11   : > { %v1114_v0 = vld [vmem:[%s250_s23 + $0x8] sm:$0xff]  ;;  %v1116_v1 = vld [vmem:[%s250_s23 + $0x18] sm:$0xff]  ;;  %v275_v2 = vld [vmem:[%s260_s26] sm:$0xff]  ;;  %s955_s12 = smul.u32 48, %s1240_s15 }
  0x12   : > { %v995_v3 = vpack.i.bf16 %v1116_v1, %v1114_v0  ;;  %v276_v4 = vld [vmem:[%s260_s26 + $0x8] sm:$0xff]  ;;  %v1120_v6 = vld [vmem:[%s250_s23] sm:$0xff]  ;;  %v1122_v7 = vld [vmem:[%s250_s23 + $0x10] sm:$0xff]  ;;  %v925_v10 = vpack.c.bf16 %v1116_v1, %v1114_v0 }
  0x13   : > { %v1000_v5 = vpack.i.bf16 %v276_v4, %v275_v2  ;;  %v1010_v9 = vpack.i.bf16 %v1122_v7, %v1120_v6  ;;  %v927_v11 = vpack.c.bf16 %v1122_v7, %v1120_v6  ;;  %v898_v1 = vld [vmem:[%s1232_s2 + $0x28] sm:$0xf]  ;;  %v907_v2 = vld [vmem:[%s1232_s2 + $0x40] sm:$0xf]  ;;  %v912_v6 = vld [vmem:[%s1232_s2 + $0x50] sm:$0xff]  ;;  %s269_s19 = scalar_lea.vmem %s1234_s4, %s955_s12 }
  0x14   : > { %996 = vrot.lane.b32.xlu1 %v995_v3, %s1056_s27  ;;  %986 = vrot.lane.b32.xlu0 %v995_v3, %s1057_s28  ;;  %v911_v4 = vld [vmem:[%s1232_s2 + $0x48] sm:$0xff]  ;;  %v354_v7 = vld [vmem:[%s1232_s2 + $0x10] sm:$0xf] }
  0x18   : > { %1001 = vrot.lane.b32.xlu1 %v1000_v5, %s1056_s27  ;;  %991 = vrot.lane.b32.xlu0 %v1000_v5, %s1057_s28 }
  0x1c   : > { %1011 = vrot.lane.b32.xlu1 %v1010_v9, %s1056_s27  ;;  %1006 = vrot.lane.b32.xlu0 %v1010_v9, %s1057_s28 }
  0x20   : > { %1021 = vrot.lane.b32.xlu1 %v1000_v5, %s1059_s29  ;;  %1016 = vrot.lane.b32.xlu0 %v995_v3, %s1059_s29  ;;  %v352_v3 = vld [vmem:[%s1232_s2] sm:$0xff]  ;;  %v353_v5 = vld [vmem:[%s1232_s2 + $0x8] sm:$0xff] }
  0x24   : > { %1026 = vrot.lane.b32.xlu0 %v1010_v9, %s1059_s29  ;;  %753 = vperm.xlu1 %1030, %v748_v12   ;;  %v913_v9 = vld [vmem:[%s1232_s2 + $0x58] sm:$0xf] }
  0x28   : > { %758 = vperm.xlu0 %1031, %v749_v13   ;;  %763 = vperm.xlu1 %1030, %v750_v15  }
  0x86   : > { %v997_v16 = vpop.permute.xlu1 %996  ;;  %v987_v17 = vpop.permute.xlu0 %986 }
  0x87   : > { %v999_v18 = vunpack.i.h.bf16 %v997_v16  ;;  %v998_v19 = vunpack.i.l.bf16 %v997_v16  ;;  %v989_v20 = vunpack.i.h.bf16 %v987_v17  ;;  %v988_v21 = vunpack.i.l.bf16 %v987_v17 }
  0x8a   : > { %v1002_v22 = vpop.permute.xlu1 %1001  ;;  %v992_v23 = vpop.permute.xlu0 %991 }
  0x8b   : > { %v1004_v24 = vunpack.i.h.bf16 %v1002_v22  ;;  %v1003_v25 = vunpack.i.l.bf16 %v1002_v22  ;;  %v994_v26 = vunpack.i.h.bf16 %v992_v23  ;;  %v993_v27 = vunpack.i.l.bf16 %v992_v23 }
  0x8d   : > { %v304_v28 = vsel %vm289_vm0, %v988_v21, %v993_v27  ;;  %v305_v29 = vsel %vm289_vm0, %v989_v20, %v994_v26  ;;  %v327_v30 = vsel %vm314_vm1, %v998_v19, %v1003_v25  ;;  %v328_v31 = vsel %vm314_vm1, %v999_v18, %v1004_v24 }
  0x8e   : > { %v1012_v32 = vpop.permute.xlu1 %1011  ;;  %v1007_v33 = vpop.permute.xlu0 %1006  ;;  %v921_v34 = vpack.c.bf16 %v305_v29, %v304_v28  ;;  %v929_v35 = vpack.c.bf16 %v328_v31, %v327_v30 }
  0x8f   : > { %v1014_v36 = vunpack.i.h.bf16 %v1012_v32  ;;  %v1013_v37 = vunpack.i.l.bf16 %v1012_v32  ;;  %v1009_v38 = vunpack.i.h.bf16 %v1007_v33  ;;  %v1008_v39 = vunpack.i.l.bf16 %v1007_v33 }
  0x90   : > { %922 = vmatprep.subr.bf16.mxu1 %v921_v34  ;;  %930 = vmatprep.subr.bf16.mxu0 %v929_v35 }
  0x91   : > { %v290_v40 = vsel %vm289_vm0, %v1008_v39, %v988_v21  ;;  %v291_v41 = vsel %vm289_vm0, %v1009_v38, %v989_v20  ;;  %v315_v42 = vsel %vm314_vm1, %v1013_v37, %v998_v19  ;;  %v316_v43 = vsel %vm314_vm1, %v1014_v36, %v999_v18 }
  0x92   : > { %v1022_v44 = vpop.permute.xlu1 %1021  ;;  %v1017_v45 = vpop.permute.xlu0 %1016  ;;  %v923_v46 = vpack.c.bf16 %v291_v41, %v290_v40  ;;  %v931_v47 = vpack.c.bf16 %v316_v43, %v315_v42 }
  0x93   : > { %v1024_v48 = vunpack.i.h.bf16 %v1022_v44  ;;  %v1023_v49 = vunpack.i.l.bf16 %v1022_v44  ;;  %v1019_v50 = vunpack.i.h.bf16 %v1017_v45  ;;  %v1018_v51 = vunpack.i.l.bf16 %v1017_v45 }
  0x94   : > { %924 = vmatpush1.bf16.msra.mxu1 %v923_v46  ;;  %932 = vmatpush1.bf16.msra.mxu0 %v931_v47 }
  0x95   : > { %v350_v54 = vsel %vm337_vm2, %v1018_v51, %v1023_v49  ;;  %v351_v55 = vsel %vm337_vm2, %v1019_v50, %v1024_v48  ;;  %926 = vmatprep.subr.bf16.mxu1 %v925_v10 }
  0x96   : > { %v1027_v56 = vpop.permute.xlu0 %1026  ;;  %v933_v57 = vpack.c.bf16 %v351_v55, %v350_v54 }
  0x97   : > { %v1029_v58 = vunpack.i.h.bf16 %v1027_v56  ;;  %v1028_v59 = vunpack.i.l.bf16 %v1027_v56  ;;  %899 = vmatmul.mubr.msk.f32.vlgmr.msra.gmra.mrb[0].mxu1 %vm359_vm3, %v896_v52  ;;  %908 = vmatmul.mubr.msk.f32.vlgmr.msra.gmra.mrb[0].mxu0 %vm359_vm3, %v905_v53 }
  0x98   : > { %934 = vmatprep.subr.bf16.mxu0 %v933_v57  ;;  %439 = vmatprep.mubr.f32.mxu1 %v1058_v8 }
  0x99   : > { %v338_v62 = vsel %vm337_vm2, %v1028_v59, %v1018_v51  ;;  %v339_v63 = vsel %vm337_vm2, %v1029_v58, %v1019_v50  ;;  %627 = vmatprep.mubr.f32.mxu0 %v1058_v8  ;;  %928 = vmatpush1.bf16.msra.mxu1 %v927_v11 }
  0x9a   : > { %v935_v0 = vpack.c.bf16 %v339_v63, %v338_v62 }
  0x9b   : > { %900 = vmatmul.mubr.msk.f32.gmra.mrb[2].mxu1 %vm359_vm3, %v897_v60  ;;  %909 = vmatmul.mubr.msk.f32.gmra.mrb[2].mxu0 %vm359_vm3, %v906_v61 }
  0x9c   : > { %936 = vmatpush1.bf16.msra.mxu0 %v935_v0  ;;  %445 = vmatprep.mubr.f32.mxu1 %v1058_v8 }
  0x9d   : > { %633 = vmatprep.mubr.f32.mxu0 %v1058_v8 }
  0x9f   : > { %901 = vmatmul.mubr.msk.f32.gmra.mrb[4].mxu1 %vm359_vm3, %v898_v1  ;;  %910 = vmatmul.mubr.msk.f32.gmra.mrb[4].mxu0 %vm359_vm3, %v907_v2 }
  0xa0   : > { %525 = vmatprep.mubr.f32.mxu1 %v1058_v8  ;;  %723 = vmatprep.mubr.f32.mxu0 %v1058_v8 }
  0xa3   : > { %902 = vmatmul.mubr.msk.f32.vlgmr.msra.gmra.mrb[0].mxu1 %vm359_vm3, %v352_v3  ;;  %914 = vmatmul.mubr.msk.f32.vlgmr.msra.gmra.mrb[0].mxu0 %vm359_vm3, %v911_v4  ;;  %v754_v10 = vpop.permute.xlu1 %753 }
  0xa4   : > { %531 = vmatprep.mubr.f32.mxu1 %v1058_v8  ;;  %729 = vmatprep.mubr.f32.mxu0 %v1058_v8 }
  0xa7   : > { %903 = vmatmul.mubr.msk.f32.gmra.mrb[2].mxu1 %vm359_vm3, %v353_v5  ;;  %915 = vmatmul.mubr.msk.f32.gmra.mrb[2].mxu0 %vm359_vm3, %v912_v6  ;;  %v759_v17 = vpop.permute.xlu0 %758  ;;  %v764_v33 = vpop.permute.xlu1 %763 }
  0xa8   : > { %537 = vmatprep.mubr.f32.mxu1 %v1058_v8  ;;  %735 = vmatprep.mubr.f32.mxu0 %v1058_v8 }
  0xab   : > { %904 = vmatmul.mubr.msk.f32.gmra.mrb[4].mxu1 %vm359_vm3, %v354_v7  ;;  %916 = vmatmul.mubr.msk.f32.gmra.mrb[4].mxu0 %vm359_vm3, %v913_v9 }
 0x176   : > { %v527_v11 = vpop.f32.mrb[0].mxu1  ;;  %v725_v12 = vpop.f32.mrb[0].mxu0 }
 0x177   : > { %v937_v13 = vadd.f32 %v725_v12, %v527_v11  ;;  %v529_v14 = vpop.f32.mrb[1].mxu1  ;;  %v727_v15 = vpop.f32.mrb[1].mxu0 }
 0x178   : > { %v938_v8 = vadd.f32 %v727_v15, %v529_v14 }
 0x179   : > { %v766_v16 = vadd.f32 %v937_v13, %v754_v10 }
 0x17a   : > { %v767_v18 = vadd.f32 %v938_v8, %v754_v10  ;;  %v533_v19 = vpop.f32.mrb[2].mxu1  ;;  %v731_v20 = vpop.f32.mrb[2].mxu0 }
 0x17b   : > { %772 = vst [vmem:[%s269_s19] sm:$0xff] %v766_v16  ;;  %v939_v21 = vadd.f32 %v731_v20, %v533_v19  ;;  %v535_v22 = vpop.f32.mrb[3].mxu1  ;;  %v733_v23 = vpop.f32.mrb[3].mxu0 }
 0x17c   : > { %773 = vst [vmem:[%s269_s19 + $0x8] sm:$0xff] %v767_v18  ;;  %v940_v24 = vadd.f32 %v733_v23, %v535_v22 }
 0x17d   : > { %v768_v25 = vadd.f32 %v939_v21, %v759_v17 }
 0x17e   : > { %v769_v26 = vadd.f32 %v940_v24, %v759_v17  ;;  %v539_v27 = vpop.f32.mrb[4].mxu1  ;;  %v737_v28 = vpop.f32.mrb[4].mxu0 }
 0x17f   : > { %774 = vst [vmem:[%s269_s19 + $0x10] sm:$0xff] %v768_v25  ;;  %v941_v29 = vadd.f32 %v737_v28, %v539_v27  ;;  %v541_v30 = vpop.f32.mrb[5].mxu1  ;;  %v739_v31 = vpop.f32.mrb[5].mxu0 }
 0x180   : > { %775 = vst [vmem:[%s269_s19 + $0x18] sm:$0xff] %v769_v26  ;;  %v942_v32 = vadd.f32 %v739_v31, %v541_v30 }
 0x181   : > { %v770_v34 = vadd.f32 %v941_v29, %v764_v33 }
 0x182   : > { %v771_v35 = vadd.f32 %v942_v32, %v764_v33 }
 0x183   : > { %776 = vst [vmem:[%s269_s19 + $0x20] sm:$0xf] %v770_v34 }
 0x184   : > { %777 = vst [vmem:[%s269_s19 + $0x28] sm:$0xf] %v771_v35 }
 0x185 PF: > { %s14_s17 = sadd.s32 1, %s1054_s17   ;;  %s1235_s15 = smov %s1050_s16 }
 0x186   : > { %p11_p5 = scmp.ge.s32.totalorder %s14_s17, 4   ;;  %s1236_s16 = smov %s1238_s18 }
 0x188   :  { %13 = sbr.rel (!%p11_p5) target bundleno = 2 (0x2), region = 72 }

</bundles_post_ra>
